<compile_context>
chip_gen: v7x
topology: tpu7x:2x2x1
jax: 0.10.0
libtpu: 0.0.40
codegen_flags: <defaults>
</compile_context>

<pallas_src>
import jax
import jax.numpy as jnp
from jax import lax
from jax.experimental import pallas as pl
from jax.experimental.pallas import tpu as pltpu

# Synthetic stand-ins for the `utils` module globals referenced in forward().
LOSS_DSR = True
LOSS_AVR = True
LOSS_BETA = 0.5
LOSS_GAMMA = 0.25

# Outer "parallel" grid axis size: shards the batch across v7x's 2 TensorCores;
# on v5e/v6e (single TC) it simply becomes two serial passes with no overhead
# beyond one extra tiny output slab.
NUM_CORES = 2


def _round_up(x: int, m: int) -> int:
    return ((x + m - 1) // m) * m


def _make_loss_kernel(total_b: int, tile_b: int, region_count: int,
                      beta: float, gamma: float, use_dsr: bool, use_avr: bool):
    inv_r = 1.0 / float(region_count)

    def kernel(labels_ref, pred_ref, attn_ref, out_ref):
        inner = pl.program_id(1)

        @pl.when(inner == 0)
        def _init():
            out_ref[...] = jnp.zeros_like(out_ref)

        # Global batch-tile index = core_id * inner_tiles + inner_step.
        tile_idx = pl.program_id(0) * pl.num_programs(1) + inner

        logits = pred_ref[...].astype(jnp.float32)          # (TB, C)
        labels = labels_ref[...]                            # (TB, 1) int32
        attn = attn_ref[...].astype(jnp.float32)            # (TB, N, R)
        tb, c = logits.shape

        # Valid-row mask (handles batch padding to num_cores * inner * tile_b).
        row_ids = tile_idx * tile_b + lax.broadcasted_iota(jnp.int32, (tb, 1), 0)
        valid = (row_ids < total_b).astype(jnp.float32)      # (TB, 1)

        # ----- CrossEntropyLoss per row: logsumexp(z) - z[label] -----
        m = jnp.max(logits, axis=-1, keepdims=True)
        z = logits - m
        col_ids = lax.broadcasted_iota(jnp.int32, (tb, c), 1)
        # Select-sum target gather (no float one-hot temp), computed before exp(z).
        tgt = jnp.sum(jnp.where(col_ids == labels, z, 0.0), axis=-1, keepdims=True)
        lse = jnp.log(jnp.sum(jnp.exp(z), axis=-1, keepdims=True))
        per_row = lse - tgt                                   # (TB, 1)

        # ----- DSR per row: sum_r (1 - sum_n attn)^2 -----
        if use_dsr:
            col_sum = jnp.sum(attn, axis=1)                   # (TB, R)
            dsr_b = jnp.sum((1.0 - col_sum) ** 2, axis=1, keepdims=True)
            per_row = per_row + beta * dsr_b

        # ----- AVR per row: sum_n ||attn[b,n,:] - 1/R||_2, expanded form -----
        if use_avr:
            sum_sq = jnp.sum(attn * attn, axis=2)             # (TB, N)
            sum_a = jnp.sum(attn, axis=2)                     # (TB, N)
            sq = sum_sq - (2.0 * inv_r) * sum_a + inv_r       # == sum_r (a - 1/R)^2
            # TODO(synk): switch to sq*rsqrt(max(sq,eps)) if a backward pass is added.
            norms = lax.sqrt(jnp.maximum(sq, 0.0))            # EUP slot
            per_row = per_row + gamma * jnp.sum(norms, axis=1, keepdims=True)

        # Raw (un-normalized) partial sum for this tile; 1/B applied in wrapper.
        tile_sum = jnp.sum(per_row * valid, axis=0, keepdims=True)   # (1, 1)
        out_ref[...] += tile_sum     # broadcast into this core's (8,128) slab

    return kernel


def custum_loss_forward(predicted, ground_truth, attention, region_count,
                        *, use_dsr=LOSS_DSR, use_avr=LOSS_AVR,
                        beta=LOSS_BETA, gamma=LOSS_GAMMA,
                        tile_b=None, num_cores=NUM_CORES):
    """Pallas equivalent of custum_loss.forward.

    predicted:    (B, C) float logits; pass bf16 directly -- the kernel casts to
                  f32 in VMEM, so feeding bf16 halves the HBM traffic.
    ground_truth: (B,)   int labels in [0, C)
    attention:    (B, N, R) float (bf16 recommended, same reason)
    region_count: python int (static), == R
    """
    B, C = predicted.shape
    Bn, N, R = attention.shape
    assert Bn == B and R == region_count

    # VMEM limit from the actual chip (v5e/v6e: 128 MiB -> 96 MiB; v7x: 64 -> 48 MiB).
    try:
        vmem_cap = int(pltpu.get_tpu_info().vmem_capacity_bytes)
    except Exception:
        vmem_cap = 64 * 1024 * 1024
    vmem_limit = min(vmem_cap * 3 // 4, 96 * 1024 * 1024)

    # Temporary-aware batch tile: double-buffered input rows plus ~3 f32 passes
    # over the (N*R) and (C) row slices for in-kernel temporaries.
    if tile_b is None:
        in_row = (predicted.dtype.itemsize * C
                  + attention.dtype.itemsize * N * R
                  + 4)                                   # labels
        f32_tmp_row = 4 * (3 * N * R + 3 * C)
        per_row = 2 * in_row + f32_tmp_row
        budget = min(24 * 1024 * 1024, vmem_limit * 6 // 10)
        tile_b = max(8, min(1024, (budget // per_row) // 8 * 8))
    tile_b = max(8, (int(tile_b) // 8) * 8)
    tile_b = min(tile_b, _round_up(B, 8))

    tiles_total = pl.cdiv(B, tile_b)
    inner_tiles = pl.cdiv(tiles_total, num_cores)
    b_pad = num_cores * inner_tiles * tile_b

    labels = ground_truth.astype(jnp.int32).reshape(B, 1)
    if b_pad != B:
        pad = b_pad - B
        predicted = jnp.pad(predicted, ((0, pad), (0, 0)))
        attention = jnp.pad(attention, ((0, pad), (0, 0), (0, 0)))
        labels = jnp.pad(labels, ((0, pad), (0, 0)))

    kernel = _make_loss_kernel(B, tile_b, region_count, beta, gamma,
                               use_dsr, use_avr)

    # TODO(synk): if R << 128 and a profile shows the kernel VALU/XLU-bound on
    # v7x, present the attention work lane-dense via a (B, N*R) layout.
    out = pl.pallas_call(
        kernel,
        out_shape=jax.ShapeDtypeStruct((num_cores * 8, 128), jnp.float32),
        grid_spec=pl.GridSpec(
            grid=(num_cores, inner_tiles),
            in_specs=[
                pl.BlockSpec((tile_b, 1),
                             lambda c, i: (c * inner_tiles + i, 0)),      # labels
                pl.BlockSpec((tile_b, C),
                             lambda c, i: (c * inner_tiles + i, 0)),      # logits
                pl.BlockSpec((tile_b, N, R),
                             lambda c, i: (c * inner_tiles + i, 0, 0)),   # attention
            ],
            out_specs=pl.BlockSpec((8, 128), lambda c, i: (c, 0)),        # per-core slab
        ),
        compiler_params=pltpu.CompilerParams(
            dimension_semantics=("parallel", "arbitrary"),
            vmem_limit_bytes=vmem_limit,
        ),
    )(labels, predicted, attention)

    # Each core's (8,128) slab holds its partial sum broadcast; pick one element
    # per core, add, and apply the single 1/B normalization here.
    partials = out[0::8, 0]
    return jnp.sum(partials) / jnp.float32(B)


def _reference(predicted, ground_truth, attention, region_count):
    """Pure-JAX reference mirroring the PyTorch module (for sanity check)."""
    logits = predicted.astype(jnp.float32)
    logz = jax.nn.logsumexp(logits, axis=-1)
    tgt = jnp.take_along_axis(logits, ground_truth[:, None], axis=-1)[:, 0]
    ce = jnp.mean(logz - tgt)
    loss = ce
    attn = attention.astype(jnp.float32)
    if LOSS_DSR:
        dsr = jnp.mean(jnp.sum((1.0 - attn.sum(axis=1)) ** 2, axis=1))
        loss = loss + LOSS_BETA * dsr
    if LOSS_AVR:
        avr = jnp.mean(jnp.sum(
            jnp.linalg.norm(attn - 1.0 / region_count, ord=2, axis=2), axis=1))
        loss = loss + LOSS_GAMMA * avr
    return loss


if __name__ == "__main__":
    key = jax.random.PRNGKey(0)
    k1, k2, k3 = jax.random.split(key, 3)

    B, C = 24, 16         # batch, num classes
    N, R = 8, 16          # attention queries, regions (Region_count = R)

    # Feed bf16 activations (kernel casts to f32 in VMEM).
    predicted = jax.random.normal(k1, (B, C), dtype=jnp.float32).astype(jnp.bfloat16)
    ground_truth = jax.random.randint(k2, (B,), 0, C, dtype=jnp.int32)
    attention = jax.nn.softmax(
        jax.random.normal(k3, (B, N, R), dtype=jnp.float32), axis=-1
    ).astype(jnp.bfloat16)

    # tile_b=8 -> 3 batch tiles over 2 "cores" (grid (2,2) with padding/masking),
    # exercising the parallel outer axis, inner accumulation, and row masking.
    loss = custum_loss_forward(predicted, ground_truth, attention, R, tile_b=8)
    loss = jax.block_until_ready(loss)

    ref = _reference(predicted, ground_truth, attention, R)
    assert jnp.allclose(loss, ref, rtol=1e-4, atol=1e-3), (loss, ref)

    print("KERNEL_OK")
</pallas_src>

<mosaic_0001>
module attributes {stable_mosaic.version = 11 : i64} {
  func.func @kernel(%arg0: i32, %arg1: i32, %arg2: memref<8x1xi32, #tpu.memory_space<vmem>>, %arg3: memref<8x16xbf16, #tpu.memory_space<vmem>>, %arg4: memref<8x8x16xbf16, #tpu.memory_space<vmem>>, %arg5: memref<8x128xf32, #tpu.memory_space<vmem>>) attributes {dimension_semantics = [#tpu.dimension_semantics<parallel>, #tpu.dimension_semantics<arbitrary>], iteration_bounds = array<i64: 2, 2>, scalar_prefetch = 0 : i64, scratch_operands = 0 : i64, tpu.core_type = #tpu.core_type<tc>, window_params = [{transform_indices = @transform_0, window_bounds = array<i64: 8, 1>}, {transform_indices = @transform_1, window_bounds = array<i64: 8, 16>}, {transform_indices = @transform_2, window_bounds = array<i64: 8, 8, 16>}, {transform_indices = @transform_3, window_bounds = array<i64: 8, 128>}]} {
    %c0_i32 = arith.constant 0 : i32
    %0 = arith.cmpi eq, %arg1, %c0_i32 : i32
    %1 = arith.extui %0 : i1 to i32
    %c0_i32_0 = arith.constant 0 : i32
    %2 = arith.cmpi ne, %1, %c0_i32_0 : i32
    scf.if %2 {
      %cst_26 = arith.constant 0.000000e+00 : f32
      %66 = vector.broadcast %cst_26 : f32 to vector<8x128xf32>
      %c0_27 = arith.constant 0 : index
      %c0_28 = arith.constant 0 : index
      %67 = vector.load %arg5[%c0_27, %c0_28] : memref<8x128xf32, #tpu.memory_space<vmem>>, vector<8x128xf32>
      tpu.vector_store %arg5[%c0_27, %c0_28], %66 {strides = array<i32>} : memref<8x128xf32, #tpu.memory_space<vmem>>, vector<8x128xf32>,
    } else {
    }
    %c2_i32 = arith.constant 2 : i32
    %3 = arith.muli %arg0, %c2_i32 : i32
    %4 = arith.addi %3, %arg1 : i32
    %c0 = arith.constant 0 : index
    %c0_1 = arith.constant 0 : index
    %5 = vector.load %arg3[%c0, %c0_1] : memref<8x16xbf16, #tpu.memory_space<vmem>>, vector<8x16xbf16>
    %6 = arith.extf %5 : vector<8x16xbf16> to vector<8x16xf32>
    %c0_2 = arith.constant 0 : index
    %c0_3 = arith.constant 0 : index
    %7 = vector.load %arg2[%c0_2, %c0_3] : memref<8x1xi32, #tpu.memory_space<vmem>>, vector<8x1xi32>
    %c0_4 = arith.constant 0 : index
    %c0_5 = arith.constant 0 : index
    %c0_6 = arith.constant 0 : index
    %8 = vector.load %arg4[%c0_4, %c0_5, %c0_6] : memref<8x8x16xbf16, #tpu.memory_space<vmem>>, vector<8x8x16xbf16>
    %9 = arith.extf %8 : vector<8x8x16xbf16> to vector<8x8x16xf32>
    %c8_i32 = arith.constant 8 : i32
    %10 = arith.muli %4, %c8_i32 : i32
    %11 = tpu.iota {dimensions = array<i32: 0>} : vector<8x1xi32>
    %12 = vector.broadcast %10 : i32 to vector<8x1xi32>
    %13 = arith.addi %12, %11 : vector<8x1xi32>
    %c24_i32 = arith.constant 24 : i32
    %14 = vector.broadcast %c24_i32 : i32 to vector<8x1xi32>
    %15 = arith.cmpi slt, %13, %14 : vector<8x1xi32>
    %16 = arith.extui %15 : vector<8x1xi1> to vector<8x1xi32>
    %17 = arith.sitofp %16 : vector<8x1xi32> to vector<8x1xf32>
    %cst = arith.constant dense<0xFF800000> : vector<8xf32>
    %18 = vector.multi_reduction <maximumf>, %6, %cst [1] : vector<8x16xf32> to vector<8xf32>
    %19 = vector.shape_cast %18 : vector<8xf32> to vector<8x1xf32>
    %20 = vector.broadcast %19 : vector<8x1xf32> to vector<8x16xf32>
    %21 = arith.subf %6, %20 : vector<8x16xf32>
    %22 = tpu.iota {dimensions = array<i32: 1>} : vector<8x16xi32>
    %23 = vector.broadcast %7 : vector<8x1xi32> to vector<8x16xi32>
    %24 = arith.cmpi eq, %22, %23 : vector<8x16xi32>
    %cst_7 = arith.constant 0.000000e+00 : f32
    %25 = vector.broadcast %cst_7 : f32 to vector<8x16xf32>
    %26 = arith.select %24, %21, %25 : vector<8x16xi1>, vector<8x16xf32>
    %cst_8 = arith.constant dense<0.000000e+00> : vector<8xf32>
    %27 = vector.multi_reduction <add>, %26, %cst_8 [1] : vector<8x16xf32> to vector<8xf32>
    %28 = vector.shape_cast %27 : vector<8xf32> to vector<8x1xf32>
    %29 = math.exp %21 : vector<8x16xf32>
    %cst_9 = arith.constant dense<0.000000e+00> : vector<8xf32>
    %30 = vector.multi_reduction <add>, %29, %cst_9 [1] : vector<8x16xf32> to vector<8xf32>
    %31 = vector.shape_cast %30 : vector<8xf32> to vector<8x1xf32>
    %32 = math.log %31 : vector<8x1xf32>
    %33 = arith.subf %32, %28 : vector<8x1xf32>
    %cst_10 = arith.constant dense<0.000000e+00> : vector<8x16xf32>
    %34 = vector.multi_reduction <add>, %9, %cst_10 [1] : vector<8x8x16xf32> to vector<8x16xf32>
    %cst_11 = arith.constant 1.000000e+00 : f32
    %35 = vector.broadcast %cst_11 : f32 to vector<8x16xf32>
    %36 = arith.subf %35, %34 : vector<8x16xf32>
    %37 = arith.mulf %36, %36 : vector<8x16xf32>
    %cst_12 = arith.constant dense<0.000000e+00> : vector<8xf32>
    %38 = vector.multi_reduction <add>, %37, %cst_12 [1] : vector<8x16xf32> to vector<8xf32>
    %39 = vector.shape_cast %38 : vector<8xf32> to vector<8x1xf32>
    %cst_13 = arith.constant 5.000000e-01 : f32
    %40 = vector.broadcast %cst_13 : f32 to vector<8x1xf32>
    %41 = arith.mulf %40, %39 : vector<8x1xf32>
    %42 = arith.addf %33, %41 : vector<8x1xf32>
    %43 = arith.mulf %9, %9 : vector<8x8x16xf32>
    %cst_14 = arith.constant dense<0.000000e+00> : vector<8x8xf32>
    %44 = vector.multi_reduction <add>, %43, %cst_14 [2] : vector<8x8x16xf32> to vector<8x8xf32>
    %cst_15 = arith.constant dense<0.000000e+00> : vector<8x8xf32>
    %45 = vector.multi_reduction <add>, %9, %cst_15 [2] : vector<8x8x16xf32> to vector<8x8xf32>
    %cst_16 = arith.constant 1.250000e-01 : f32
    %46 = vector.broadcast %cst_16 : f32 to vector<8x8xf32>
    %47 = arith.mulf %46, %45 : vector<8x8xf32>
    %48 = arith.subf %44, %47 : vector<8x8xf32>
    %cst_17 = arith.constant 6.250000e-02 : f32
    %49 = vector.broadcast %cst_17 : f32 to vector<8x8xf32>
    %50 = arith.addf %48, %49 : vector<8x8xf32>
    %cst_18 = arith.constant 0.000000e+00 : f32
    %51 = vector.broadcast %cst_18 : f32 to vector<8x8xf32>
    %52 = arith.maximumf %50, %51 : vector<8x8xf32>
    %53 = math.sqrt %52 : vector<8x8xf32>
    %cst_19 = arith.constant dense<0.000000e+00> : vector<8xf32>
    %54 = vector.multi_reduction <add>, %53, %cst_19 [1] : vector<8x8xf32> to vector<8xf32>
    %55 = vector.shape_cast %54 : vector<8xf32> to vector<8x1xf32>
    %cst_20 = arith.constant 2.500000e-01 : f32
    %56 = vector.broadcast %cst_20 : f32 to vector<8x1xf32>
    %57 = arith.mulf %56, %55 : vector<8x1xf32>
    %58 = arith.addf %42, %57 : vector<8x1xf32>
    %59 = arith.mulf %58, %17 : vector<8x1xf32>
    %cst_21 = arith.constant dense<0.000000e+00> : vector<1xf32>
    %60 = vector.multi_reduction <add>, %59, %cst_21 [0] : vector<8x1xf32> to vector<1xf32>
    %61 = vector.shape_cast %60 : vector<1xf32> to vector<1x1xf32>
    %c0_22 = arith.constant 0 : index
    %c0_23 = arith.constant 0 : index
    %62 = vector.load %arg5[%c0_22, %c0_23] : memref<8x128xf32, #tpu.memory_space<vmem>>, vector<8x128xf32>
    %63 = vector.broadcast %61 : vector<1x1xf32> to vector<8x128xf32>
    %64 = arith.addf %62, %63 : vector<8x128xf32>
    %c0_24 = arith.constant 0 : index
    %c0_25 = arith.constant 0 : index
    %65 = vector.load %arg5[%c0_24, %c0_25] : memref<8x128xf32, #tpu.memory_space<vmem>>, vector<8x128xf32>
    tpu.vector_store %arg5[%c0_24, %c0_25], %64 {strides = array<i32>} : memref<8x128xf32, #tpu.memory_space<vmem>>, vector<8x128xf32>,
    return
  }
  func.func @transform_0(%arg0: i32, %arg1: i32) -> (i32, i32) {
    %c2_i32 = arith.constant 2 : i32
    %0 = arith.muli %arg0, %c2_i32 : i32
    %1 = arith.addi %0, %arg1 : i32
    %c0_i32 = arith.constant 0 : i32
    %c0_i32_0 = arith.constant 0 : i32
    return %1, %c0_i32 : i32, i32
  }
  func.func @transform_1(%arg0: i32, %arg1: i32) -> (i32, i32) {
    %c2_i32 = arith.constant 2 : i32
    %0 = arith.muli %arg0, %c2_i32 : i32
    %1 = arith.addi %0, %arg1 : i32
    %c0_i32 = arith.constant 0 : i32
    %c0_i32_0 = arith.constant 0 : i32
    return %1, %c0_i32 : i32, i32
  }
  func.func @transform_2(%arg0: i32, %arg1: i32) -> (i32, i32, i32) {
    %c2_i32 = arith.constant 2 : i32
    %0 = arith.muli %arg0, %c2_i32 : i32
    %1 = arith.addi %0, %arg1 : i32
    %c0_i32 = arith.constant 0 : i32
    %c0_i32_0 = arith.constant 0 : i32
    %c0_i32_1 = arith.constant 0 : i32
    return %1, %c0_i32, %c0_i32_0 : i32, i32, i32
  }
  func.func @transform_3(%arg0: i32, %arg1: i32) -> (i32, i32) {
    %c0_i32 = arith.constant 0 : i32
    %c0_i32_0 = arith.constant 0 : i32
    return %arg0, %c0_i32 : i32, i32
  }
}

</mosaic_0001>

<bundles_post_ra>
// kernel: tpu_custom_call.1
= control target key start
LH: loop header
LB: loop body
LE: loop exit
PB: predicated region body
PF: predicated region fallthrough
CT: control target
= control target key end

     0   :  { %8 = vsyncpa [#allocation3], 0  ;;  %s1282_s0 = inlined_call_operand.vmem [shape: s32[32,1], index: 0, kind: input, shape index: {}]   ;;  %s1283_s1 = inlined_call_operand.vmem [shape: bf16[32,16], index: 1, kind: input, shape index: {}]   ;;  %s1284_s2 = inlined_call_operand.vmem [shape: bf16[32,8,16], index: 2, kind: input, shape index: {}]   ;;  %s1285_s3 = inlined_call_operand.hbm [shape: f32[16,128], index: 3, kind: output, shape index: {}]  }
   0x1   :  { %10 = vsyncpa [#allocation3 + $0x1], 0  ;;  %s986_s12 = smov 0   ;;  %s988_s13 = smov 0  }
   0x2   :  { %s990_s14 = smov 0   ;;  %s992_s15 = smov 0  }
   0x3   :  { %s994_s16 = smov 0   ;;  %s996_s17 = smov 0  }
   0x4   :  { %s998_s18 = smov 0   ;;  %s1000_s19 = smov 0  }
   0x5 LB: > { %1289 = sst [smem:[#allocation5_spill]] %s956_s18  ;;  %s724_s20 = sadd.s32 4294967295, %s960_s19   ;;  %s960_s19 = sphi %s1000_s19, %s16_s19   ;;  %s956_s18 = sphi %s998_s18, %s1297_s18   ;;  %s952_s17 = sphi %s996_s17, %s1302_s17   ;;  %s948_s16 = sphi %s994_s16, %s1295_s16   ;;  %s944_s15 = sphi %s992_s15, %s1301_s15   ;;  %s940_s14 = sphi %s990_s14, %s1300_s14   ;;  %s936_s13 = sphi %s988_s13, %s1299_s13   ;;  %s932_s12 = sphi %s986_s12, %s1298_s12  }
   0x6   : > { %s725_s21 = sadd.s32 4294967294, %s960_s19   ;;  %s25_s22 = sadd.s32 1, %s952_s17 }
   0x7   : > { %p26_p0 = scmp.ge.s32.totalorder %s25_s22, 2  ;;  %s28_s23 = sadd.s32 1, %s956_s18 }
   0x8   : > { %p135_p1 = scmp.ne.s32.totalorder %s940_s14, %s936_s13  ;;  %p136_p2 = scmp.eq.s32.totalorder %s724_s20, 3 }
   0x9   : > { %s1304_s22 = smov (%p26_p0, %s25_s22), 0  ;;  %s1306_s23 = smov (!%p26_p0, %s28_s23), %s956_s18 }
   0xa   : > { %1290 = sst [smem:[#allocation6_spill]] %s1304_s22  ;;  %p1035_p3 = por %p136_p2, %p135_p1 }
   0xb   : > { %p141_p4 = scmp.ne.s32.totalorder %s936_s13, %s932_s12  ;;  %p30_p5 = scmp.ge.s32.totalorder %s1306_s23, 2 }
   0xc   : > { %p142_p6 = scmp.eq.s32.totalorder %s725_s21, 3  ;;  %p734_p7 = scmp.ge.s32.totalorder %s960_s19, 1 }
   0xd   : > { %p195_p8 = scmp.lt.s32.totalorder %s960_s19, 5  ;;  %s1308_s23 = smov (%p30_p5, %s1306_s23), 0 }
   0xe   : > { %1292 = sst [smem:[#allocation7_spill]] %s1308_s23  ;;  %p1045_p9 = por %p142_p6, %p141_p4 }
   0xf   : > { %p196_p10 = pnand %p734_p7, %p195_p8  ;;  %s122_s26 = ssub.s32 %s956_s18, %s1308_s23 }
  0x10   : > { %s125_s27 = sadd.s32 1, %s940_s14  ;;  %p123_p11 = scmp.eq.s32.totalorder %s122_s26, 0 }
  0x11   : > { %199 = sbr.rel (%p196_p10) target bundleno = 410 (0x19a), region = 32  ;;  %s1286_s29 = sand.u32 (!%p196_p10), 1, %s936_s13  }
  0x12   : > { %s1053_s28 = scalar_select %p123_p11, %s940_s14, %s125_s27  }
  0x13   : > { %s736_s30 = sshll.u32 (!%p196_p10), %s948_s16, 1  ;;  %s735_s4 = sshll.u32 (!%p196_p10), %s1286_s29, 3 }
  0x14   : > { %s234_s5 = sadd.s32 (!%p196_p10), %s944_s15, %s736_s30  ;;  %s1077_s18 = scalar_lea.vmem (!%p196_p10), [#allocation2], %s735_s4 }
  0x15   : > { %p235_p12 = scmp.lt.s32.totalorder (!%p196_p10), %s234_s5, 3  ;;  %s1060_s6 = sshll.u32 (!%p196_p10), %s234_s5, 3 }
  0x16   : > { %p252_p13 = scmp.lt.s32.totalorder (!%p196_p10), %s1060_s6, 31  ;;  %p743_p0 = scmp.ne.s32.totalorder (!%p196_p10), %s944_s15, 0 }
  0x18   : > { %s1310_s5 = smov (!%p235_p12, %s234_s5), 3  ;;  %262 = sbr.rel (%p743_p0) target bundleno = 31 (0x1f), region = 36 }
  0x19   : > { %s737_s7 = sshll.u32 %s1310_s5, 3  ;;  %s739_s8 = sshll.u32 %s1310_s5, 2  ;;  %v962_v0 = vmov (!%p743_p0), 0.0  }
  0x1a   : > { %s1066_s11 = scalar_lea.vmem %s1282_s0, %s737_s7  ;;  %s246_s26 = scalar_lea.vmem %s1283_s1, %s739_s8  ;;  %263 = vst [vmem:[%s1077_s18] sm:$0xff] (!%p743_p0), %v962_v0 }
  0x1b   : > { %s253_s27 = scalar_select %p252_p13, %s1060_s6, 31 }
  0x1d   : > { %s742_s30 = sshll.u32 %s253_s27, 2 }
  0x1e   : > { %s1075_s22 = scalar_lea.vmem %s1284_s2, %s742_s30 }
  0x1f PF: > { %v767_v1 = vld [vmem:[%s1075_s22 + $0x8] sm:$0xff]   ;;  %vm293_vm0 = vcmask 130048   ;;  %v752_v2 = vld [vmem:[%s1075_s22] sm:$0xff]   ;;  %v768_v26 = vld [vmem:[%s1075_s22 + $0x10] sm:$0xff]   ;;  %vm396_vm1 = vcmask 1041409   ;;  %v963_v53 = vmov 0  }
  0x20   : > { %v1083_v3 = vld [vmem:[%s246_s26] sm:$0xf]  ;;  %v757_v4 = vunpack.c.l.bf16 %v767_v1  ;;  %v753_v5 = vunpack.c.l.bf16 %v752_v2  ;;  %v754_v6 = vunpack.c.h.bf16 %v752_v2  ;;  %v758_v22 = vunpack.c.h.bf16 %v767_v1  ;;  %v769_v43 = vld [vmem:[%s1075_s22 + $0x18] sm:$0xff]   ;;  %844 = vset.pattern.permute.xlu1 %v963_v53  ;;  %845 = vset.pattern.permute.xlu0 %v963_v53  ;;  %s748_s15 = sshll.u32 %s948_s16, 7  ;;  %s630_s22 = sshll.u32 %s1077_s18, 4  ;;  %s1228_s22 = int_to_ptr.vmem [resolvable:$true] %s630_s22 }
  0x21   : > { %v267_v7 = vunpack.c.l.bf16 %v1083_v3  ;;  %v761_v31 = vunpack.c.l.bf16 %v768_v26  ;;  %v762_v39 = vunpack.c.h.bf16 %v768_v26  ;;  %v765_v49 = vunpack.c.l.bf16 %v769_v43  ;;  %s1226_s4 = scalar_lea.hbm %s1285_s3, %s748_s15  ;;  %s1294_s5 = sand.u32 1, %s936_s13  }
  0x22   : > { %v330_v8 = vsel %vm293_vm0, %v757_v4, 0.0  ;;  %v316_v9 = vsel %vm293_vm0, %v753_v5, 0.0  ;;  %v323_v10 = vsel %vm293_vm0, %v754_v6, 0.0  ;;  %v416_v14 = vmul.f32 %v753_v5, %v753_v5  ;;  %s866_s7 = scalar_lea.vmem %s1228_s22, 128  ;;  %s965_s16 = smov [#allocation2]  }
  0x23   : > { %452 = vadd.xlane.f32.xlu1 %v330_v8  ;;  %448 = vadd.xlane.f32.xlu0 %v316_v9  ;;  %v317_v11 = vrot.slane %v316_v9, 4  ;;  %v324_v12 = vrot.slane %v323_v10, 4  ;;  %v294_v13 = vsel %vm293_vm0, %v267_v7, -inf  ;;  %v417_v15 = vmul.f32 %v754_v6, %v754_v6  ;;  %p867_p1 = scmp.ne.s32.totalorder %s1228_s22, %s866_s7  ;;  %s870_s8 = sshll.u32 %s965_s16, 4  ;;  %s871_s8 = int_to_ptr.vmem [resolvable:$false] %s870_s8 }
  0x24   : > { %v424_v20 = vsel %vm293_vm0, %v416_v14, 0.0  ;;  %v418_v23 = vmul.f32 %v757_v4, %v757_v4  ;;  %v337_v29 = vsel %vm293_vm0, %v758_v22, 0.0  ;;  %v419_v32 = vmul.f32 %v758_v22, %v758_v22  ;;  %s872_s9 = scalar_lea.vmem %s871_s8, 256  ;;  %p873_p5 = scmp.lt.s32.totalorder %s1228_s22, %s871_s8 }
  0x25   : > { %v318_v16 = vadd.f32 %v317_v11, %v316_v9  ;;  %v325_v17 = vadd.f32 %v324_v12, %v323_v10  ;;  %v427_v21 = vsel %vm293_vm0, %v417_v15, 0.0  ;;  %v344_v37 = vsel %vm293_vm0, %v761_v31, 0.0  ;;  %p868_p2 = pnand %p867_p1, %p1035_p3  ;;  %p874_p6 = scmp.lt.s32.totalorder %s872_s9, %s866_s7 }
  0x26   : > { %v430_v30 = vsel %vm293_vm0, %v418_v23, 0.0  ;;  %v433_v38 = vsel %vm293_vm0, %v419_v32, 0.0  ;;  %v420_v40 = vmul.f32 %v761_v31, %v761_v31  ;;  %v331_v44 = vrot.slane %v330_v8, 4 }
  0x27   : > { %v319_v18 = vrot.slane %v318_v16, 2  ;;  %v326_v19 = vrot.slane %v325_v17, 2  ;;  %450 = vadd.xlane.f32.xlu0 %v323_v10  ;;  %295 = vmax.xlane.f32.xlu1 %v294_v13  ;;  %v338_v46 = vrot.slane %v337_v29, 4  ;;  %v351_v47 = vsel %vm293_vm0, %v762_v39, 0.0  ;;  %p869_p4 = pneg %p868_p2  ;;  %p875_p7 = por %p874_p6, %p873_p5 }
  0x28   : > { %v436_v48 = vsel %vm293_vm0, %v420_v40, 0.0  ;;  %v421_v50 = vmul.f32 %v762_v39, %v762_v39  ;;  %v345_v51 = vrot.slane %v344_v37, 4  ;;  %v352_v52 = vrot.slane %v351_v47, 4 }
  0x29   : > { %v320_v24 = vadd.f32 %v319_v18, %v318_v16  ;;  %v327_v25 = vadd.f32 %v326_v19, %v325_v17  ;;  %v332_v54 = vadd.f32 %v331_v44, %v330_v8  ;;  %v339_v55 = vadd.f32 %v338_v46, %v337_v29  ;;  %p876_p8 = pnand %p875_p7, %p869_p4 }
  0x2a   : > { %v358_v56 = vsel %vm293_vm0, %v765_v49, 0.0  ;;  %v439_v57 = vsel %vm293_vm0, %v421_v50, 0.0  ;;  %v766_v58 = vunpack.c.h.bf16 %v769_v43  ;;  %v422_v59 = vmul.f32 %v765_v49, %v765_v49 }
  0x2b   : > { %v321_v27 = vrot.slane %v320_v24, 1  ;;  %v328_v28 = vrot.slane %v327_v25, 1  ;;  %425 = vadd.xlane.f32.xlu0 %v424_v20  ;;  %428 = vadd.xlane.f32.xlu1 %v427_v21  ;;  %v346_v60 = vadd.f32 %v345_v51, %v344_v37  ;;  %v359_v61 = vrot.slane %v358_v56, 4 }
  0x2c   : > { %v353_v62 = vadd.f32 %v352_v52, %v351_v47  ;;  %v333_v63 = vrot.slane %v332_v54, 2  ;;  %v340_v0 = vrot.slane %v339_v55, 2  ;;  %v365_v1 = vsel %vm293_vm0, %v766_v58, 0.0 }
  0x2d   : > { %v322_v33 = vadd.f32 %v321_v27, %v320_v24  ;;  %v329_v34 = vadd.f32 %v328_v28, %v327_v25  ;;  %v442_v2 = vsel %vm293_vm0, %v422_v59, 0.0  ;;  %v423_v4 = vmul.f32 %v766_v58, %v766_v58 }
  0x2e   : > { %v347_v5 = vrot.slane %v346_v60, 2  ;;  %v360_v6 = vadd.f32 %v359_v61, %v358_v56  ;;  %v354_v8 = vrot.slane %v353_v62, 2  ;;  %v366_v9 = vrot.slane %v365_v1, 4 }
  0x2f   : > { %v372_v35 = vsub.f32 1.0, %v322_v33  ;;  %v373_v36 = vsub.f32 1.0, %v329_v34  ;;  %454 = vadd.xlane.f32.xlu0 %v337_v29  ;;  %431 = vadd.xlane.f32.xlu1 %v430_v30  ;;  %v334_v10 = vadd.f32 %v333_v63, %v332_v54  ;;  %v341_v11 = vadd.f32 %v340_v0, %v339_v55  ;;  %v268_v33 = vld [vmem:[%s1066_s11] sm:$0xff] }
  0x30   : > { %v445_v12 = vsel %vm293_vm0, %v423_v4, 0.0  ;;  %v348_v13 = vadd.f32 %v347_v5, %v346_v60  ;;  %v361_v14 = vrot.slane %v360_v6, 2  ;;  %v355_v15 = vadd.f32 %v354_v8, %v353_v62 }
  0x31   : > { %v380_v41 = vmul.f32 %v372_v35, %v372_v35  ;;  %v381_v42 = vmul.f32 %v373_v36, %v373_v36  ;;  %v367_v16 = vadd.f32 %v366_v9, %v365_v1  ;;  %v335_v17 = vrot.slane %v334_v10, 1 }
  0x32   : > { %v342_v18 = vrot.slane %v341_v11, 1  ;;  %v349_v19 = vrot.slane %v348_v13, 1  ;;  %v362_v20 = vadd.f32 %v361_v14, %v360_v6  ;;  %v356_v21 = vrot.slane %v355_v15, 1 }
  0x33   : > { %v1101_v45 = vsel %vm396_vm1, %v381_v42, %v380_v41  ;;  %456 = vadd.xlane.f32.xlu0 %v344_v37  ;;  %434 = vadd.xlane.f32.xlu1 %v433_v38  ;;  %v368_v22 = vrot.slane %v367_v16, 2  ;;  %v336_v23 = vadd.f32 %v335_v17, %v334_v10  ;;  %vm398_vm2 = vcmask 1042434  }
  0x34   : > { %v343_v24 = vadd.f32 %v342_v18, %v341_v11  ;;  %v350_v25 = vadd.f32 %v349_v19, %v348_v13  ;;  %v363_v26 = vrot.slane %v362_v20, 1  ;;  %v357_v27 = vadd.f32 %v356_v21, %v355_v15 }
  0x35   : > { %v369_v28 = vadd.f32 %v368_v22, %v367_v16  ;;  %v374_v29 = vsub.f32 1.0, %v336_v23  ;;  %vm400_vm3 = vcmask 1043459   ;;  %vm402_vm4 = vcmask 1044484  }
  0x36   : > { %v375_v30 = vsub.f32 1.0, %v343_v24  ;;  %v376_v31 = vsub.f32 1.0, %v350_v25  ;;  %v364_v32 = vadd.f32 %v363_v26, %v362_v20  ;;  %v377_v34 = vsub.f32 1.0, %v357_v27 }
  0x37   : > { %458 = vadd.xlane.f32.xlu0 %v351_v47  ;;  %437 = vadd.xlane.f32.xlu1 %v436_v48  ;;  %v370_v35 = vrot.slane %v369_v28, 1  ;;  %v382_v36 = vmul.f32 %v374_v29, %v374_v29  ;;  %vm404_vm5 = vcmask 1045509   ;;  %vm406_vm6 = vcmask 1046534  }
  0x38   : > { %v383_v37 = vmul.f32 %v375_v30, %v375_v30  ;;  %v384_v38 = vmul.f32 %v376_v31, %v376_v31  ;;  %v378_v39 = vsub.f32 1.0, %v364_v32  ;;  %v385_v40 = vmul.f32 %v377_v34, %v377_v34 }
  0x39   : > { %v371_v41 = vadd.f32 %v370_v35, %v369_v28  ;;  %v399_v42 = vsel %vm398_vm2, %v382_v36, %v1101_v45  ;;  %vm408_vm7 = vcmask 1047559   ;;  %v286_v29 = vlaneseq }
  0x3a   : > { %v401_v44 = vsel %vm400_vm3, %v383_v37, %v399_v42  ;;  %v386_v46 = vmul.f32 %v378_v39, %v378_v39 }
  0x3b   : > { %460 = vadd.xlane.f32.xlu0 %v358_v56  ;;  %440 = vadd.xlane.f32.xlu1 %v439_v57  ;;  %v379_v43 = vsub.f32 1.0, %v371_v41  ;;  %v403_v47 = vsel %vm402_vm4, %v384_v38, %v401_v44  ;;  %v299_v36 = vand.u32 127, %v286_v29 }
  0x3c   : > { %v405_v49 = vsel %vm404_vm5, %v385_v40, %v403_v47 }
  0x3d   : > { %v387_v48 = vmul.f32 %v379_v43, %v379_v43  ;;  %v407_v50 = vsel %vm406_vm6, %v386_v46, %v405_v49  ;;  %v1146_v43 = vshrl.u32 %v286_v29, 7 }
  0x3f   : > { %462 = vadd.xlane.f32.xlu0 %v365_v1  ;;  %443 = vadd.xlane.f32.xlu1 %v442_v2  ;;  %v1118_v51 = vsel %vm408_vm7, %v387_v48, %v407_v50 }
  0x43   : > { %446 = vadd.xlane.f32.xlu0 %v445_v12 }
  0x50   : > { %301 = vperm.xlu1 %844, %v268_v33  }
  0xb0   : > { %v453_v45 = vpop.xlane.xlu1 %452  ;;  %v449_v52 = vpop.xlane.xlu0 %448 }
  0xb1   : > { %v464_v57 = vmul.f32 0.125, %v449_v52  ;;  %v466_v62 = vmul.f32 0.125, %v453_v45 }
  0xb4   : > { %v451_v53 = vpop.xlane.xlu0 %450  ;;  %v296_v54 = vpop.xlane.xlu1 %295 }
  0xb5   : > { %v1122_v55 = vsub.f32 %v267_v7, %v296_v54  ;;  %v465_v60 = vmul.f32 0.125, %v451_v53  ;;  %v1157_v54 = vsub.s32 %v299_v36, %v1146_v43 }
  0xb7   : > { %v308_v56 = vmul.f32 1.442695, %v1122_v55 }
  0xb8   : > { %v426_v58 = vpop.xlane.xlu0 %425  ;;  %v429_v59 = vpop.xlane.xlu1 %428 }
  0xb9   : > { %846 = vpow2.f32 %v308_v56  ;;  %v472_v61 = vsub.f32 %v426_v58, %v464_v57  ;;  %v473_v63 = vsub.f32 %v429_v59, %v465_v60 }
  0xbb   : > { %v480_v4 = vadd.f32 0.0625, %v472_v61  ;;  %v481_v5 = vadd.f32 0.0625, %v473_v63 }
  0xbc   : > { %v455_v0 = vpop.xlane.xlu0 %454  ;;  %v432_v1 = vpop.xlane.xlu1 %431 }
  0xbd   : > { %v474_v2 = vsub.f32 %v432_v1, %v466_v62  ;;  %v467_v6 = vmul.f32 0.125, %v455_v0  ;;  %v1125_v10 = vmax.f32 %v480_v4, 0.0  ;;  %v1127_v12 = vmax.f32 %v481_v5, 0.0 }
  0xbf   : > { %v482_v7 = vadd.f32 0.0625, %v474_v2  ;;  %848 = vrsqrt.f32 %v1125_v10  ;;  %vm498_vm9 = vcmp.eq.f32.partialorder %v1125_v10, inf  ;;  %vm500_vm10 = vcmp.eq.f32.partialorder %v1125_v10, 0.0 }
  0xc0   : > { %v457_v8 = vpop.xlane.xlu0 %456  ;;  %v435_v3 = vpop.xlane.xlu1 %434  ;;  %850 = vrsqrt.f32 %v1127_v12  ;;  %v501_v57 = vand.u32 2147483648, %v1125_v10  ;;  %vm505_vm11 = vcmp.eq.f32.partialorder %v1127_v12, inf  ;;  %vm507_vm12 = vcmp.eq.f32.partialorder %v1127_v12, 0.0 }
  0xc1   : > { %v475_v9 = vsub.f32 %v435_v3, %v467_v6  ;;  %v1129_v14 = vmax.f32 %v482_v7, 0.0  ;;  %v468_v15 = vmul.f32 0.125, %v457_v8  ;;  %v508_v61 = vand.u32 2147483648, %v1127_v12 }
  0xc3   : > { %v847_v11 = vpop.eup %846  ;;  %v483_v13 = vadd.f32 0.0625, %v475_v9  ;;  %852 = vrsqrt.f32 %v1129_v14  ;;  %vm512_vm13 = vcmp.eq.f32.partialorder %v1129_v14, inf  ;;  %vm514_vm14 = vcmp.eq.f32.partialorder %v1129_v14, 0.0 }
  0xc4   : > { %v459_v16 = vpop.xlane.xlu0 %458  ;;  %v438_v17 = vpop.xlane.xlu1 %437  ;;  %v310_v18 = vsel %vm293_vm0, %v847_v11, 0.0  ;;  %v515_v0 = vand.u32 2147483648, %v1129_v14 }
  0xc5   : > { %311 = vadd.xlane.f32.xlu0 %v310_v18  ;;  %v1133_v19 = vmax.f32 %v483_v13, 0.0  ;;  %v476_v20 = vsub.f32 %v438_v17, %v468_v15  ;;  %v469_v21 = vmul.f32 0.125, %v459_v16 }
  0xc7   : > { %v484_v22 = vadd.f32 0.0625, %v476_v20  ;;  %854 = vrsqrt.f32 %v1133_v19  ;;  %vm519_vm15 = vcmp.eq.f32.partialorder %v1133_v19, inf  ;;  %v522_v1 = vand.u32 2147483648, %v1133_v19 }
  0xc8   : > { %v461_v23 = vpop.xlane.xlu0 %460  ;;  %v441_v24 = vpop.xlane.xlu1 %440 }
  0xc9   : > { %v477_v25 = vsub.f32 %v441_v24, %v469_v21  ;;  %v1138_v26 = vmax.f32 %v484_v22, 0.0  ;;  %v470_v27 = vmul.f32 0.125, %v461_v23  ;;  %v849_v37 = vpop.eup %848 }
  0xca   : > { %v851_v40 = vpop.eup %850  ;;  %v497_v50 = vmul.f32 %v849_v37, %v1125_v10 }
  0xcb   : > { %v485_v28 = vadd.f32 0.0625, %v477_v25  ;;  %856 = vrsqrt.f32 %v1138_v26  ;;  %v504_v45 = vmul.f32 %v851_v40, %v1127_v12  ;;  %v529_v7 = vand.u32 2147483648, %v1138_v26 }
  0xcc   : > { %v463_v30 = vpop.xlane.xlu0 %462  ;;  %v444_v31 = vpop.xlane.xlu1 %443  ;;  %v499_v60 = vsel %vm498_vm9, %v1125_v10, %v497_v50  ;;  %vm521_vm9 = vcmp.eq.f32.partialorder %v1133_v19, 0.0 }
  0xcd   : > { %v1141_v32 = vmax.f32 %v485_v28, 0.0  ;;  %v478_v33 = vsub.f32 %v444_v31, %v470_v27  ;;  %v471_v34 = vmul.f32 0.125, %v463_v30  ;;  %v853_v44 = vpop.eup %852  ;;  %v502_v5 = vsel %vm500_vm10, %v501_v57, %v499_v60 }
  0xce   : > { %v511_v52 = vmul.f32 %v853_v44, %v1129_v14  ;;  %v563_v15 = vrot.slane %v502_v5, %v1157_v54  ;;  %v288_v44 = vstv %s1060_s6  ;;  %s617_s6 = scalar_lea.sflag [#allocation3], %s1294_s5 }
  0xcf   : > { %858 = vrsqrt.f32 %v1141_v32  ;;  %v486_v35 = vadd.f32 0.0625, %v478_v33  ;;  %vm535_vm10 = vcmp.eq.f32.partialorder %v1141_v32, 0.0  ;;  %v536_v10 = vand.u32 2147483648, %v1141_v32 }
  0xd0   : > { %v447_v38 = vpop.xlane.xlu0 %446  ;;  %v302_v39 = vpop.permute.xlu1 %301  ;;  %v513_v63 = vsel %vm512_vm13, %v1129_v14, %v511_v52 }
  0xd1   : > { %v1144_v41 = vmax.f32 %v486_v35, 0.0  ;;  %v479_v42 = vsub.f32 %v447_v38, %v471_v34  ;;  %vm303_vm8 = vcmp.eq.s32.totalorder %v299_v36, %v302_v39  ;;  %v855_v47 = vpop.eup %854  ;;  %v516_v3 = vsel %vm514_vm14, %v515_v0, %v513_v63 }
  0xd2   : > { %v304_v46 = vsel %vm303_vm8, %v1122_v55, 0.0  ;;  %v411_v55 = vsel %vm293_vm0, %v1118_v51, 0.0  ;;  %v518_v58 = vmul.f32 %v855_v47, %v1133_v19  ;;  %v506_v51 = vsel %vm505_vm11, %v1127_v12, %v504_v45 }
  0xd3   : > { %860 = vrsqrt.f32 %v1144_v41  ;;  %v487_v48 = vadd.f32 0.0625, %v479_v42  ;;  %v305_v49 = vsel %vm293_vm0, %v304_v46, 0.0  ;;  %vm526_vm0 = vcmp.eq.f32.partialorder %v1138_v26, inf }
  0xd4   : > { %306 = vadd.xlane.f32.xlu0 %v305_v49  ;;  %v520_v2 = vsel %vm519_vm15, %v1133_v19, %v518_v58  ;;  %v509_v6 = vsel %vm507_vm12, %v508_v61, %v506_v51  ;;  %vm533_vm8 = vcmp.eq.f32.partialorder %v1141_v32, inf  ;;  %vm528_vm11 = vcmp.eq.f32.partialorder %v1138_v26, 0.0  ;;  %v613_v61 = vld [vmem:[%s1077_s18] sm:$0xff] }
  0xd5   : > { %v1154_v53 = vmax.f32 %v487_v48, 0.0  ;;  %v857_v56 = vpop.eup %856  ;;  %v523_v13 = vsel %vm521_vm9, %v522_v1, %v520_v2  ;;  %v567_v16 = vrot.slane %v509_v6, %v1157_v54  ;;  %vm540_vm12 = vcmp.eq.f32.partialorder %v1144_v41, inf }
  0xd6   : > { %v525_v59 = vmul.f32 %v857_v56, %v1138_v26  ;;  %v543_v18 = vand.u32 2147483648, %v1144_v41  ;;  %v571_v19 = vrot.slane %v516_v3, %v1157_v54  ;;  %vm542_vm13 = vcmp.eq.f32.partialorder %v1144_v41, 0.0 }
  0xd7   : > { %862 = vrsqrt.f32 %v1154_v53  ;;  %v575_v21 = vrot.slane %v523_v13, %v1157_v54  ;;  %v592_v27 = vsel %vm396_vm1, %v567_v16, %v563_v15  ;;  %vm547_vm14 = vcmp.eq.f32.partialorder %v1154_v53, inf }
  0xd8   : > { %412 = vadd.xlane.f32.xlu0 %v411_v55  ;;  %v527_v8 = vsel %vm526_vm0, %v1138_v26, %v525_v59  ;;  %v550_v28 = vand.u32 2147483648, %v1154_v53  ;;  %v593_v30 = vsel %vm398_vm2, %v571_v19, %v592_v27  ;;  %vm549_vm15 = vcmp.eq.f32.partialorder %v1154_v53, 0.0 }
  0xd9   : > { %v859_v62 = vpop.eup %858  ;;  %v530_v12 = vsel %vm528_vm11, %v529_v7, %v527_v8  ;;  %vm600_vm1 = vcmask 64512   ;;  %v289_v48 = vadd.s32 %v288_v44, %v1146_v43 }
  0xda   : > { %v532_v4 = vmul.f32 %v859_v62, %v1141_v32  ;;  %v579_v24 = vrot.slane %v530_v12, %v1157_v54 }
  0xdb   : > { %vm290_vm2 = vcmp.lt.s32.totalorder %v289_v48, 24 }
  0xdc   : > { %v534_v9 = vsel %vm533_vm8, %v1141_v32, %v532_v4  ;;  %v594_v32 = vsel %vm400_vm3, %v575_v21, %v593_v30 }
  0xdd   : > { %v861_v11 = vpop.eup %860  ;;  %v537_v17 = vsel %vm535_vm10, %v536_v10, %v534_v9  ;;  %v595_v34 = vsel %vm402_vm4, %v579_v24, %v594_v32 }
  0xde   : > { %v539_v14 = vmul.f32 %v861_v11, %v1144_v41  ;;  %v583_v26 = vrot.slane %v537_v17, %v1157_v54 }
  0xe0   : > { %v541_v20 = vsel %vm540_vm12, %v1144_v41, %v539_v14  ;;  %v596_v36 = vsel %vm404_vm5, %v583_v26, %v595_v34 }
  0xe1   : > { %v863_v22 = vpop.eup %862  ;;  %v544_v23 = vsel %vm542_vm13, %v543_v18, %v541_v20 }
  0xe2   : > { %v546_v25 = vmul.f32 %v863_v22, %v1154_v53  ;;  %v587_v29 = vrot.slane %v544_v23, %v1157_v54 }
  0xe4   : > { %v548_v31 = vsel %vm547_vm14, %v1154_v53, %v546_v25  ;;  %v597_v37 = vsel %vm406_vm6, %v587_v29, %v596_v36 }
  0xe5   : > { %v551_v33 = vsel %vm549_vm15, %v550_v28, %v548_v31 }
  0xe6   : > { %v591_v35 = vrot.slane %v551_v33, %v1157_v54  ;;  %v964_v54 = vmov 0.0  }
  0xe7   : > { %v746_v55 = vsel %vm290_vm2, 1.0, %v964_v54 }
  0xe8   : > { %v598_v38 = vsel %vm408_vm7, %v591_v35, %v597_v37 }
  0xe9   : > { %v601_v39 = vsel %vm600_vm1, %v598_v38, 0.0 }
  0xea   : > { %602 = vadd.xlane.f32.xlu0 %v601_v39 }
 0x152   : > { %v312_v40 = vpop.xlane.xlu0 %311 }
 0x153   : > { %864 = vlog2.f32 %v312_v40 }
 0x15d   : > { %v865_v42 = vpop.eup %864 }
 0x15e   : > { %v314_v47 = vmul.f32 0.6931472, %v865_v42 }
 0x161   : > { %v307_v41 = vpop.xlane.xlu0 %306 }
 0x162   : > { %v315_v50 = vsub.f32 %v314_v47, %v307_v41 }
 0x165   : > { %v413_v46 = vpop.xlane.xlu0 %412 }
 0x166   : > { %v414_v49 = vmul.f32 0.5, %v413_v46 }
 0x168   : > { %v415_v52 = vadd.f32 %v414_v49, %v315_v50 }
 0x177   : > { %v603_v45 = vpop.xlane.xlu0 %602 }
 0x178   : > { %v604_v53 = vmul.f32 0.25, %v603_v45 }
 0x17a   : > { %v605_v56 = vadd.f32 %v604_v53, %v415_v52 }
 0x17c   : > { %v606_v57 = vmul.f32 %v746_v55, %v605_v56 }
 0x17e   : > { %v607_v58 = vrot.slane %v606_v57, 4 }
 0x180   : > { %v608_v59 = vadd.f32 %v607_v58, %v606_v57 }
 0x182   : > { %v609_v60 = vrot.slane %v608_v59, 2 }
 0x184   : > { %v610_v43 = vadd.f32 %v609_v60, %v608_v59 }
 0x186   : > { %v611_v51 = vrot.slane %v610_v43, 1 }
 0x188   : > { %v612_v62 = vadd.f32 %v611_v51, %v610_v43 }
 0x18a   : > { %v614_v63 = vadd.f32 %v613_v61, %v612_v62 }
 0x18c   : > { %615 = vst [vmem:[%s1077_s18] sm:$0xff] %v614_v63 }
 0x18d   : > { %879 = shalt.err (!%p876_p8)
}
 0x18e   : > { %s880_s18 = scalar_lea.hbm %s1226_s4, 128  ;;  %s884_s20 = scalar_lea.hbm %s1285_s3, 256 }
 0x18f   : > { %p881_p10 = scmp.ne.s32.totalorder %s1226_s4, %s880_s18  ;;  %p885_p13 = scmp.lt.u32.totalorder %s1226_s4, %s1285_s3 }
 0x190   : > { %p886_p0 = scmp.lt.u32.totalorder %s884_s20, %s880_s18  ;;  %p888_p2 = scmp.lt.u32.totalorder %s880_s18, %s1226_s4 }
 0x191   : > { %p882_p11 = pnand %p881_p10, %p1035_p3 }
 0x192   : > { %p887_p1 = por %p886_p0, %p885_p13 }
 0x193   : > { %p883_p12 = pneg %p882_p11 }
 0x194   : > { %p889_p4 = por %p888_p2, %p887_p1 }
 0x196   : > { %p890_p5 = pnand %p889_p4, %p883_p12 }
 0x198   : > { %893 = shalt.err (!%p890_p5)
}
 0x199   : > { %770 = dma.vmem_to_hbm [thread:$0]  (%p1035_p3), %s1228_s22, 128, %s1226_s4, %s617_s6  }
 0x19a PF: > { %p776_p6 = scmp.ge.s32.totalorder %s960_s19, 2  ;;  %s642_s27 = sand.u32 1, %s932_s12  }
 0x19b   : > { %s643_s30 = scalar_lea.sflag [#allocation3], %s642_s27 }
 0x19c   : > { %p773_p7 = pnand %p776_p6, %p1045_p9 }
 0x19e   : > { %927 = dma.done.wait (!%p773_p7), %s643_s30, 128  }
 0x19f   : > { %929 = vsyncadd (!%p773_p7), %s643_s30, 4294967168  ;;  %s16_s19 = sadd.s32 1, %s960_s19   ;;  %s1295_s16 = sld [smem:[#allocation5_spill]] }
 0x1a0   : > { %p13_p8 = scmp.ge.s32.totalorder %s16_s19, 6   ;;  %s1296_s24 = sld [smem:[#allocation6_spill]] }
 0x1a1   : > { %s1297_s18 = sld [smem:[#allocation7_spill]]  ;;  %s1298_s12 = smov %s936_s13 }
 0x1a2   : > { %s1299_s13 = smov %s940_s14  ;;  %s1300_s14 = smov %s1053_s28 }
 0x1a3   : > { %s1301_s15 = smov %s952_s17  ;;  %15 = sbr.rel (!%p13_p8) target bundleno = 5 (0x5), region = 77 }
 0x1a6   : > { %s1302_s17 = smov %s1296_s24 }
 0x1aa   :  { %648 = vsyncpa [#allocation3], 1 }
 0x1ab   :  { %650 = vsyncpa [#allocation3 + $0x1], 1 }

</bundles_post_ra>
